<compile_context>
chip_gen: v6e
topology: v6e:2x2x1
jax: 0.10.0
libtpu: 0.0.40
codegen_flags: <defaults>
</compile_context>

<pallas_src>
import functools

import jax
import jax.numpy as jnp
from jax.experimental import pallas as pl
from jax.experimental.pallas import tpu as pltpu

EPS = 0.01
_MIB = 1024 * 1024
_MAX_TILE_Q = 1024


def _vmem_budget_and_limit():
    """Generation-aware VMEM working-set budget + scoped-vmem limit to request."""
    phys = None
    try:
        phys = int(pltpu.get_tpu_info().vmem_capacity_bytes)
    except Exception:
        phys = None
    if phys is None:
        kind = ""
        try:
            kind = jax.devices()[0].device_kind.lower()
        except Exception:
            pass
        if "v5" in kind or "v6" in kind:
            phys = 128 * _MIB      # v5e / v6e physical VMEM per core
        else:
            phys = 64 * _MIB       # v7x (and conservative unknown default)
    budget = max(12 * _MIB, min(56 * _MIB, int(phys * 0.45)))
    limit = int(min(phys - 8 * _MIB, budget + 16 * _MIB))
    return budget, limit


def _pick_tiles(sq, sk, itemsize, budget_bytes, tile_q=None):
    """Pick (tile_q, tile_k). Working set per grid step:
    2x double-buffered x-in + 2x out (x dtype) + 2 resident f32 scratch tiles."""
    per_elem = 4 * itemsize + 2 * 4
    max_elems = max(budget_bytes // per_elem, 8 * 128)

    # Keep the key dim whole (lane-dense stores) unless even 8 rows overflow the
    # budget; then tile keys in multiples of 128 lanes (guard for very long Sk).
    if sk * 8 <= max_elems:
        tile_k = sk
    else:
        tile_k = min(sk, max(128, ((max_elems // 8) // 128) * 128))
    cap = min(_MAX_TILE_Q, max(8, max_elems // tile_k))

    if tile_q is not None:
        # Explicit override: clamp to a legal shape (multiple of 8 or full dim).
        tile_q = int(tile_q)
        tile_q = sq if tile_q >= sq else max(8, (tile_q // 8) * 8)
        return tile_q, tile_k

    if sq <= cap:
        return sq, tile_k

    # Prefer a multiple-of-8 divisor of sq (no ragged last tile) ...
    d = (min(cap, sq) // 8) * 8
    while d >= 8:
        if sq % d == 0:
            return d, tile_k
        d -= 8
    # ... otherwise use a cdiv grid with a masked ragged last tile.
    return max(8, (cap // 8) * 8), tile_k


def _kerple_power_kernel(bias_p_ref, bias_a_ref, wei_p_ref, wei_a_ref,
                         x_ref, o_ref, wei_sc, bias_sc):
    h = pl.program_id(0)
    q = pl.program_id(1)
    k = pl.program_id(2)
    b = pl.program_id(3)

    # wei/bias depend only on (head, q-tile, k-tile), not on batch: build once on
    # the first batch element and reuse across the innermost, sequentially-iterated
    # ("arbitrary") B axis. Correctness of this reuse REQUIRES B to stay the last
    # grid axis (and not be split across cores).
    @pl.when(b == 0)
    def _():
        bp = bias_p_ref[h]
        ba = bias_a_ref[h]
        wp = wei_p_ref[h]
        wa = wei_a_ref[h]

        tq, tk = wei_sc.shape
        rows = jax.lax.broadcasted_iota(jnp.int32, (tq, tk), 0) + q * tq
        cols = jax.lax.broadcasted_iota(jnp.int32, (tq, tk), 1) + k * tk
        diff = jnp.maximum(rows - cols, 0).astype(jnp.float32)

        pos = diff > 0.0
        # diff ** p computed as exp(p * log(diff)); diff == 0 masked to 0
        # (exponents are clamped to >= eps > 0, so 0 ** p == 0).
        logd = jnp.log(jnp.maximum(diff, 1.0))
        bias_sc[...] = jnp.where(pos, jnp.exp(bp * logd), 0.0) * (-ba)
        wei_sc[...] = jnp.exp(jnp.where(pos, jnp.exp(wp * logd), 0.0) * (-wa))
        # TODO(synk): Toeplitz rework -- 1-D distance tables + per-sublane
        # pltpu.roll would cut this EUP work by ~tile_q x (matters for small B).

    o_ref[...] = (x_ref[...].astype(jnp.float32) * wei_sc[...]
                  + bias_sc[...]).astype(o_ref.dtype)


def _kerple_power_decode_kernel(bias_p_ref, bias_a_ref, wei_p_ref, wei_a_ref,
                                x_ref, o_ref, *, seq_len_k):
    h = pl.program_id(0)
    k = pl.program_id(1)
    bp = bias_p_ref[h]
    ba = bias_a_ref[h]
    wp = wei_p_ref[h]
    wa = wei_a_ref[h]

    _, tk = x_ref.shape                         # (B, tile_k): batch on sublanes
    cols = jax.lax.broadcasted_iota(jnp.int32, (1, tk), 1) + k * tk
    diff = jnp.maximum((seq_len_k - 1) - cols, 0).astype(jnp.float32)
    pos = diff > 0.0
    logd = jnp.log(jnp.maximum(diff, 1.0))
    bias = jnp.where(pos, jnp.exp(bp * logd), 0.0) * (-ba)            # (1, tk)
    wei = jnp.exp(jnp.where(pos, jnp.exp(wp * logd), 0.0) * (-wa))    # (1, tk)
    o_ref[...] = (x_ref[...].astype(jnp.float32) * wei + bias).astype(o_ref.dtype)


def kerple_power(x, bias_p, bias_a, wei_p, wei_a, *, tile_q=None,
                 donate_x=False, core_parallel_heads=False):
    """KERPLE power bias: out = x * wei + bias. x: [B, H, Sq, Sk]; params: [H]."""
    B, H, Sq, Sk = x.shape
    itemsize = x.dtype.itemsize
    budget, vmem_limit = _vmem_budget_and_limit()

    # Parameter clamping (the PyTorch forward clamps in-place before use).
    bias_p = jnp.clip(jnp.asarray(bias_p, jnp.float32).reshape(-1), EPS, 2.0)
    bias_a = jnp.maximum(jnp.asarray(bias_a, jnp.float32).reshape(-1), EPS)
    wei_p = jnp.clip(jnp.asarray(wei_p, jnp.float32).reshape(-1), EPS, 2.0)
    wei_a = jnp.maximum(jnp.asarray(wei_a, jnp.float32).reshape(-1), EPS)

    smem_spec = pl.BlockSpec(memory_space=pltpu.MemorySpace.SMEM)
    io_alias = {4: 0} if donate_x else {}   # x is the 5th positional input

    if Sq != Sk:
        assert Sq == 1, "sq != sk only supported for the sq == 1 decode path"
        # Decode: one lane-dense (B, tile_k) block per (head, key-tile); the whole
        # batch is folded into the sublane axis of a single grid step.
        max_elems = max(budget // (4 * itemsize), 8 * 128)
        if B * Sk <= max_elems:
            tile_k = Sk
        else:
            tile_k = min(Sk, max(128, ((max_elems // max(B, 1)) // 128) * 128))
        n_k = pl.cdiv(Sk, tile_k)
        x_spec = pl.BlockSpec((B, None, None, tile_k), lambda h, k: (0, h, 0, k))
        cost = pl.CostEstimate(flops=2 * B * H * Sk,
                               transcendentals=4 * H * Sk,
                               bytes_accessed=2 * B * H * Sk * itemsize)
        return pl.pallas_call(
            functools.partial(_kerple_power_decode_kernel, seq_len_k=Sk),
            out_shape=jax.ShapeDtypeStruct(x.shape, x.dtype),
            grid=(H, n_k),
            in_specs=[smem_spec] * 4 + [x_spec],
            out_specs=x_spec,
            input_output_aliases=io_alias,
            compiler_params=pltpu.CompilerParams(
                dimension_semantics=("parallel", "arbitrary"),
                vmem_limit_bytes=vmem_limit),
            cost_estimate=cost,
        )(bias_p, bias_a, wei_p, wei_a, x)

    # Training path (sq == sk).
    tile_q, tile_k = _pick_tiles(Sq, Sk, itemsize, budget, tile_q)
    n_q = pl.cdiv(Sq, tile_q)
    n_k = pl.cdiv(Sk, tile_k)

    x_spec = pl.BlockSpec((None, None, tile_q, tile_k),
                          lambda h, q, k, b: (b, h, q, k))
    # B must stay the LAST (sequential / "arbitrary") axis: the wei/bias scratch is
    # built at b == 0 and reused for b > 0 of the same (h, q, k) tile.
    grid = (H, n_q, n_k, B)
    head_sem = pltpu.CORE_PARALLEL if core_parallel_heads else "parallel"
    cost = pl.CostEstimate(flops=2 * B * H * Sq * Sk,
                           transcendentals=4 * H * Sq * Sk,   # amortized over B
                           bytes_accessed=2 * B * H * Sq * Sk * itemsize)

    return pl.pallas_call(
        _kerple_power_kernel,
        out_shape=jax.ShapeDtypeStruct(x.shape, x.dtype),
        grid=grid,
        in_specs=[smem_spec] * 4 + [x_spec],
        out_specs=x_spec,
        scratch_shapes=[
            pltpu.VMEM((tile_q, tile_k), jnp.float32),  # wei  (persists over B)
            pltpu.VMEM((tile_q, tile_k), jnp.float32),  # bias (persists over B)
        ],
        input_output_aliases=io_alias,
        compiler_params=pltpu.CompilerParams(
            dimension_semantics=(head_sem, "parallel", "parallel", "arbitrary"),
            vmem_limit_bytes=vmem_limit),
        cost_estimate=cost,
    )(bias_p, bias_a, wei_p, wei_a, x)


def kerple_power_ref(x, bias_p, bias_a, wei_p, wei_a):
    """Pure-JAX reference mirroring the PyTorch forward."""
    sq, sk = x.shape[-2], x.shape[-1]
    r = jnp.arange(sk)
    diff = jnp.tril(r[:, None] - r[None, :]).astype(jnp.float32)  # [sk, sk]

    bp = jnp.clip(bias_p, EPS, 2.0)[:, None, None]
    ba = jnp.maximum(bias_a, EPS)[:, None, None]
    wp = jnp.clip(wei_p, EPS, 2.0)[:, None, None]
    wa = jnp.maximum(wei_a, EPS)[:, None, None]

    bias = -jnp.power(diff[None], bp) * ba          # [H, sk, sk]
    wei = jnp.exp(-jnp.power(diff[None], wp) * wa)  # [H, sk, sk]
    if sq != sk:
        assert sq == 1
        bias = bias[:, sk - 1:sk, :]
        wei = wei[:, sk - 1:sk, :]
    return x * wei[None] + bias[None]


if __name__ == "__main__":
    key = jax.random.PRNGKey(0)
    kx, kbp, kba, kwp, kwa = jax.random.split(key, 5)

    B, H, S = 2, 4, 128

    # Deterministic parameter init matching the module's __init__ ('uniform'):
    bias_p = jax.random.uniform(kbp, (H,), dtype=jnp.float32) * 2.0
    bias_a = jax.random.uniform(kba, (H,), dtype=jnp.float32) * 1.0
    wei_p = jax.random.uniform(kwp, (H,), dtype=jnp.float32) * 2.0
    wei_a = jax.random.uniform(kwa, (H,), dtype=jnp.float32) * 1.0

    # 1) training path (sq == sk), auto tiles (full block at this size).
    x = jax.random.normal(kx, (B, H, S, S), dtype=jnp.float32)
    ref = kerple_power_ref(x, bias_p, bias_a, wei_p, wei_a)
    out = jax.block_until_ready(kerple_power(x, bias_p, bias_a, wei_p, wei_a))
    assert out.shape == x.shape and out.dtype == x.dtype
    assert jnp.allclose(out, ref, atol=1e-5, rtol=1e-5), "mismatch (training path)"

    # 2) explicit q-tile: exercises q tiling + scratch reuse across the batch axis.
    out_t = jax.block_until_ready(
        kerple_power(x, bias_p, bias_a, wei_p, wei_a, tile_q=32))
    assert jnp.allclose(out_t, ref, atol=1e-5, rtol=1e-5), "mismatch (tiled path)"

    # 3) ragged last q-tile (cdiv grid with masked partial block).
    xr = jax.random.normal(kx, (1, 2, 96, 96), dtype=jnp.float32)
    refr = kerple_power_ref(xr, bias_p[:2], bias_a[:2], wei_p[:2], wei_a[:2])
    outr = jax.block_until_ready(
        kerple_power(xr, bias_p[:2], bias_a[:2], wei_p[:2], wei_a[:2], tile_q=64))
    assert jnp.allclose(outr, refr, atol=1e-5, rtol=1e-5), "mismatch (ragged path)"

    # 4) decode path (sq == 1): batch folded into one lane-dense block per head.
    x1 = jax.random.normal(kx, (B, H, 1, S), dtype=jnp.float32)
    ref1 = kerple_power_ref(x1, bias_p, bias_a, wei_p, wei_a)
    out1 = jax.block_until_ready(kerple_power(x1, bias_p, bias_a, wei_p, wei_a))
    assert jnp.allclose(out1, ref1, atol=1e-5, rtol=1e-5), "mismatch (decode path)"

    # 5) bf16 scores + in-place (aliased) output buffer.
    xb = jax.random.normal(kx, (B, H, S, S), dtype=jnp.bfloat16)
    refb = kerple_power_ref(xb.astype(jnp.float32), bias_p, bias_a, wei_p, wei_a)
    outb = jax.block_until_ready(
        kerple_power(xb, bias_p, bias_a, wei_p, wei_a, donate_x=True))
    assert outb.dtype == jnp.bfloat16
    assert jnp.allclose(outb.astype(jnp.float32), refb, rtol=2e-2, atol=0.1), \
        "mismatch (bf16/aliased path)"

    print("KERNEL_OK")
</pallas_src>

<mosaic_0001>
module attributes {stable_mosaic.version = 11 : i64} {
  func.func @_kerple_power_kernel(%arg0: i32, %arg1: i32, %arg2: i32, %arg3: i32, %arg4: memref<4xf32, #tpu.memory_space<smem>>, %arg5: memref<4xf32, #tpu.memory_space<smem>>, %arg6: memref<4xf32, #tpu.memory_space<smem>>, %arg7: memref<4xf32, #tpu.memory_space<smem>>, %arg8: memref<1x1x128x128xf32, #tpu.memory_space<vmem>>, %arg9: memref<1x1x128x128xf32, #tpu.memory_space<vmem>>, %arg10: memref<128x128xf32, #tpu.memory_space<vmem>>, %arg11: memref<128x128xf32, #tpu.memory_space<vmem>>) attributes {dimension_semantics = [#tpu.dimension_semantics<parallel>, #tpu.dimension_semantics<parallel>, #tpu.dimension_semantics<parallel>, #tpu.dimension_semantics<arbitrary>], iteration_bounds = array<i64: 4, 1, 1, 2>, scalar_prefetch = 0 : i64, scratch_operands = 2 : i64, tpu.core_type = #tpu.core_type<tc>, window_params = [{transform_indices = @transform_0, window_bounds = array<i64: 4>}, {transform_indices = @transform_1, window_bounds = array<i64: 4>}, {transform_indices = @transform_2, window_bounds = array<i64: 4>}, {transform_indices = @transform_3, window_bounds = array<i64: 4>}, {transform_indices = @transform_4, window_bounds = array<i64: 1, 1, 128, 128>}, {transform_indices = @transform_5, window_bounds = array<i64: 1, 1, 128, 128>}]} {
    %c0_i32 = arith.constant 0 : i32
    %0 = arith.cmpi eq, %arg3, %c0_i32 : i32
    %1 = arith.extui %0 : i1 to i32
    %c0_i32_0 = arith.constant 0 : i32
    %2 = arith.cmpi ne, %1, %c0_i32_0 : i32
    scf.if %2 {
      %12 = arith.index_cast %arg0 : i32 to index
      %13 = memref.load %arg4[%12] : memref<4xf32, #tpu.memory_space<smem>>
      %14 = arith.index_cast %arg0 : i32 to index
      %15 = memref.load %arg5[%14] : memref<4xf32, #tpu.memory_space<smem>>
      %16 = arith.index_cast %arg0 : i32 to index
      %17 = memref.load %arg6[%16] : memref<4xf32, #tpu.memory_space<smem>>
      %18 = arith.index_cast %arg0 : i32 to index
      %19 = memref.load %arg7[%18] : memref<4xf32, #tpu.memory_space<smem>>
      %20 = tpu.iota {dimensions = array<i32: 0>} : vector<128x128xi32>
      %c128_i32 = arith.constant 128 : i32
      %21 = arith.muli %arg1, %c128_i32 : i32
      %22 = vector.broadcast %21 : i32 to vector<128x128xi32>
      %23 = arith.addi %20, %22 : vector<128x128xi32>
      %24 = tpu.iota {dimensions = array<i32: 1>} : vector<128x128xi32>
      %c128_i32_12 = arith.constant 128 : i32
      %25 = arith.muli %arg2, %c128_i32_12 : i32
      %26 = vector.broadcast %25 : i32 to vector<128x128xi32>
      %27 = arith.addi %24, %26 : vector<128x128xi32>
      %28 = arith.subi %23, %27 : vector<128x128xi32>
      %c0_i32_13 = arith.constant 0 : i32
      %29 = vector.broadcast %c0_i32_13 : i32 to vector<128x128xi32>
      %30 = arith.maxsi %28, %29 : vector<128x128xi32>
      %31 = arith.sitofp %30 : vector<128x128xi32> to vector<128x128xf32>
      %cst = arith.constant 0.000000e+00 : f32
      %32 = vector.broadcast %cst : f32 to vector<128x128xf32>
      %33 = arith.cmpf ogt, %31, %32 : vector<128x128xf32>
      %cst_14 = arith.constant 1.000000e+00 : f32
      %34 = vector.broadcast %cst_14 : f32 to vector<128x128xf32>
      %35 = arith.maximumf %31, %34 : vector<128x128xf32>
      %36 = math.log %35 : vector<128x128xf32>
      %37 = vector.broadcast %13 : f32 to vector<128x128xf32>
      %38 = arith.mulf %37, %36 : vector<128x128xf32>
      %39 = math.exp %38 : vector<128x128xf32>
      %cst_15 = arith.constant 0.000000e+00 : f32
      %40 = vector.broadcast %cst_15 : f32 to vector<128x128xf32>
      %41 = arith.select %33, %39, %40 : vector<128x128xi1>, vector<128x128xf32>
      %cst_16 = arith.constant 0.000000e+00 : f32
      %42 = arith.subf %cst_16, %15 : f32
      %43 = vector.broadcast %42 : f32 to vector<128x128xf32>
      %44 = arith.mulf %41, %43 : vector<128x128xf32>
      %c0_17 = arith.constant 0 : index
      %c0_18 = arith.constant 0 : index
      %45 = vector.load %arg11[%c0_17, %c0_18] : memref<128x128xf32, #tpu.memory_space<vmem>>, vector<128x128xf32>
      tpu.vector_store %arg11[%c0_17, %c0_18], %44 {strides = array<i32>} : memref<128x128xf32, #tpu.memory_space<vmem>>, vector<128x128xf32>,
      %46 = vector.broadcast %17 : f32 to vector<128x128xf32>
      %47 = arith.mulf %46, %36 : vector<128x128xf32>
      %48 = math.exp %47 : vector<128x128xf32>
      %cst_19 = arith.constant 0.000000e+00 : f32
      %49 = vector.broadcast %cst_19 : f32 to vector<128x128xf32>
      %50 = arith.select %33, %48, %49 : vector<128x128xi1>, vector<128x128xf32>
      %cst_20 = arith.constant 0.000000e+00 : f32
      %51 = arith.subf %cst_20, %19 : f32
      %52 = vector.broadcast %51 : f32 to vector<128x128xf32>
      %53 = arith.mulf %50, %52 : vector<128x128xf32>
      %54 = math.exp %53 : vector<128x128xf32>
      %c0_21 = arith.constant 0 : index
      %c0_22 = arith.constant 0 : index
      %55 = vector.load %arg10[%c0_21, %c0_22] : memref<128x128xf32, #tpu.memory_space<vmem>>, vector<128x128xf32>
      tpu.vector_store %arg10[%c0_21, %c0_22], %54 {strides = array<i32>} : memref<128x128xf32, #tpu.memory_space<vmem>>, vector<128x128xf32>,
    } else {
    }
    %c0 = arith.constant 0 : index
    %c0_1 = arith.constant 0 : index
    %c0_2 = arith.constant 0 : index
    %c0_3 = arith.constant 0 : index
    %3 = vector.load %arg8[%c0, %c0_1, %c0_2, %c0_3] : memref<1x1x128x128xf32, #tpu.memory_space<vmem>>, vector<1x1x128x128xf32>
    %4 = vector.shape_cast %3 : vector<1x1x128x128xf32> to vector<128x128xf32>
    %c0_4 = arith.constant 0 : index
    %c0_5 = arith.constant 0 : index
    %5 = vector.load %arg10[%c0_4, %c0_5] : memref<128x128xf32, #tpu.memory_space<vmem>>, vector<128x128xf32>
    %6 = arith.mulf %4, %5 : vector<128x128xf32>
    %c0_6 = arith.constant 0 : index
    %c0_7 = arith.constant 0 : index
    %7 = vector.load %arg11[%c0_6, %c0_7] : memref<128x128xf32, #tpu.memory_space<vmem>>, vector<128x128xf32>
    %8 = arith.addf %6, %7 : vector<128x128xf32>
    %c0_8 = arith.constant 0 : index
    %c0_9 = arith.constant 0 : index
    %c0_10 = arith.constant 0 : index
    %c0_11 = arith.constant 0 : index
    %9 = vector.load %arg9[%c0_8, %c0_9, %c0_10, %c0_11] : memref<1x1x128x128xf32, #tpu.memory_space<vmem>>, vector<1x1x128x128xf32>
    %10 = vector.shape_cast %9 : vector<1x1x128x128xf32> to vector<128x128xf32>
    %11 = vector.shape_cast %8 : vector<128x128xf32> to vector<1x1x128x128xf32>
    tpu.vector_store %arg9[%c0_8, %c0_9, %c0_10, %c0_11], %11 {strides = array<i32>} : memref<1x1x128x128xf32, #tpu.memory_space<vmem>>, vector<1x1x128x128xf32>,
    return
  }
  func.func @transform_0(%arg0: i32, %arg1: i32, %arg2: i32, %arg3: i32) -> i32 {
    %c0_i32 = arith.constant 0 : i32
    %c0_i32_0 = arith.constant 0 : i32
    return %c0_i32 : i32
  }
  func.func @transform_1(%arg0: i32, %arg1: i32, %arg2: i32, %arg3: i32) -> i32 {
    %c0_i32 = arith.constant 0 : i32
    %c0_i32_0 = arith.constant 0 : i32
    return %c0_i32 : i32
  }
  func.func @transform_2(%arg0: i32, %arg1: i32, %arg2: i32, %arg3: i32) -> i32 {
    %c0_i32 = arith.constant 0 : i32
    %c0_i32_0 = arith.constant 0 : i32
    return %c0_i32 : i32
  }
  func.func @transform_3(%arg0: i32, %arg1: i32, %arg2: i32, %arg3: i32) -> i32 {
    %c0_i32 = arith.constant 0 : i32
    %c0_i32_0 = arith.constant 0 : i32
    return %c0_i32 : i32
  }
  func.func @transform_4(%arg0: i32, %arg1: i32, %arg2: i32, %arg3: i32) -> (i32, i32, i32, i32) {
    %c0_i32 = arith.constant 0 : i32
    return %arg3, %arg0, %arg1, %arg2 : i32, i32, i32, i32
  }
  func.func @transform_5(%arg0: i32, %arg1: i32, %arg2: i32, %arg3: i32) -> (i32, i32, i32, i32) {
    %c0_i32 = arith.constant 0 : i32
    return %arg3, %arg0, %arg1, %arg2 : i32, i32, i32, i32
  }
}

</mosaic_0001>

<bundles_post_ra>
// kernel: tpu_custom_call.1
= control target key start
LH: loop header
LB: loop body
LE: loop exit
PB: predicated region body
PF: predicated region fallthrough
CT: control target
= control target key end

     0   :  { %s2060_s0 = inlined_call_operand.hbm [shape: f32[4], index: 0, kind: input, shape index: {}]   ;;  %s2061_s1 = inlined_call_operand.vmem [shape: f32[4], index: 1, kind: input, shape index: {}]   ;;  %s2062_s2 = inlined_call_operand.vmem [shape: f32[4], index: 2, kind: input, shape index: {}]   ;;  %s2063_s3 = inlined_call_operand.vmem [shape: f32[4], index: 3, kind: input, shape index: {}]   ;;  %s2064_s4 = inlined_call_operand.hbm [shape: f32[2,4,128,128], index: 4, kind: input, shape index: {}]   ;;  %s2065_s5 = inlined_call_operand.hbm [shape: f32[2,4,128,128], index: 5, kind: output, shape index: {}]  }
   0x1   :  { %2074 = sst [smem:[#allocation23_spill]] %s2060_s0 }
   0x2   :  { %2075 = sst [smem:[#allocation24_spill]] %s2061_s1 }
   0x3   :  { %2076 = sst [smem:[#allocation25_spill]] %s2062_s2 }
   0x4   :  { %2077 = sst [smem:[#allocation26_spill]] %s2063_s3 }
   0x5   :  { %2078 = sst [smem:[#allocation27_spill]] %s2065_s5 }
   0x6   :  { %10 = vsyncpa [#allocation7], 0 }
   0x7   :  { %11 = vsyncpa [#allocation8], 0 }
   0x8   :  { %12 = vsyncpa [#allocation11], 0 }
   0x9   :  { %13 = vsyncpa [#allocation5], 0 }
   0xa   :  { %15 = vsyncpa [#allocation5 + $0x1], 0 }
   0xb   :  { %16 = vsyncpa [#allocation6], 0 }
   0xc   :  { %18 = vsyncpa [#allocation6 + $0x1], 0  ;;  %s1547_s18 = smov 0   ;;  %s1549_s19 = smov 0  }
   0xd   :  { %s1551_s20 = smov 0   ;;  %s1553_s21 = smov 0  }
   0xe   :  { %s1555_s22 = smov 0   ;;  %s1557_s23 = smov 0  }
   0xf   :  { %s1559_s24 = smov 0   ;;  %s1561_s25 = smov 0  }
  0x10 LB: > { %2079 = sst [smem:[#allocation20_spill]] %s1477_s18  ;;  %s1004_s26 = sadd.s32 4294967295, %s1505_s25   ;;  %s1505_s25 = sphi %s1561_s25, %s24_s25   ;;  %s1501_s24 = sphi %s1559_s24, %s2110_s24   ;;  %s1497_s23 = sphi %s1557_s23, %s2109_s23   ;;  %s1493_s22 = sphi %s1555_s22, %s2108_s22   ;;  %s1489_s21 = sphi %s1553_s21, %s2107_s21   ;;  %s1485_s20 = sphi %s1551_s20, %s2106_s20   ;;  %s1481_s19 = sphi %s1549_s19, %s2105_s19   ;;  %s1477_s18 = sphi %s1547_s18, %s2104_s18  }
  0x11   : > { %s1005_s27 = sadd.s32 4294967294, %s1505_s25   ;;  %p160_p0 = scmp.ne.s32.totalorder %s1481_s19, %s1477_s18 }
  0x12   : > { %p1591_p1 = scmp.eq.s32.totalorder %s1004_s26, 0  ;;  %p1595_p2 = scmp.eq.s32.totalorder %s1004_s26, 7 }
  0x13   : > { %p196_p3 = scmp.eq.s32.totalorder %s1005_s27, 7  ;;  %p1006_p5 = scmp.ge.s32.totalorder %s1505_s25, 1 }
  0x14   : > { %s2080_s28 = scalar_select %p1591_p1, 1, 0 }
  0x15   : > { %s2081_s29 = scalar_select %p1595_p2, 1, 0 }
  0x16   : > { %p1601_p4 = por %p1591_p1, %p160_p0  ;;  %p1606_p6 = por %p196_p3, %p160_p0 }
  0x17   : > { %p203_p7 = scmp.lt.s32.totalorder %s1505_s25, 9  ;;  %s2085_s2 = sld [smem:[#allocation25_spill]] }
  0x18   : > { %s2082_s30 = scalar_select %p1601_p4, 1, 0 }
  0x19   : > { %s2083_s6 = scalar_select %p1606_p6, 1, 0 }
  0x1a   : > { %p1614_p8 = pnand %p1006_p5, %p203_p7  ;;  %s2088_s1 = sld [smem:[#allocation24_spill]] }
  0x1b   : > { %2084 = sst [smem:[#allocation21_spill]] %s2083_s6 }
  0x1c   : > { %s2086_s10 = scalar_select %p1614_p8, 1, 0 }
  0x1d   : > { %s236_s9 = sshll.u32 %s2085_s2, 4  ;;  %p1082_p9 = pneg %p1614_p8  ;;  %s237_s9 = int_to_ptr.vmem [resolvable:$true] %s236_s9 }
  0x1e   : > { %s1313_s15 = scalar_lea.vmem %s237_s9, 16  ;;  %p1321_p3 = scmp.lt.s32.totalorder %s237_s9, %s237_s9 }
  0x1f   : > { %p1622_p10 = pnand %p1082_p9, %p1591_p1  ;;  %p1314_p11 = scmp.ne.s32.totalorder %s237_s9, %s1313_s15 }
  0x20   : > { %s225_s14 = sshll.u32 %s2088_s1, 4  ;;  %p1322_p5 = scmp.lt.s32.totalorder %s1313_s15, %s1313_s15  ;;  %s226_s14 = int_to_ptr.vmem [resolvable:$true] %s225_s14 }
  0x21   : > { %p1315_p12 = pneg %p1622_p10 }
  0x22   : > { %p1323_p7 = por %p1322_p5, %p1321_p3 }
  0x23   : > { %p1316_p13 = pnand %p1315_p12, %p1314_p11 }
  0x25   : > { %p1317_p0 = pneg %p1316_p13 }
  0x27   : > { %p1324_p9 = pnand %p1323_p7, %p1317_p0 }
  0x29   : > { %1327 = shalt.err (!%p1324_p9)
}
  0x2a   : > { %s1507_s16 = smov [#allocation10]   ;;  %s1508_s17 = smov [#allocation4]  }
  0x2b   : > { %1091 = dma.vmem_to_smem (!%p1622_p10), %s237_s9, 16, %s1507_s16, [#allocation11]  }
  0x2c   : > { %s2089_s0 = sld [smem:[#allocation23_spill]]  ;;  %s1339_s13 = scalar_lea.vmem %s226_s14, 16 }
  0x2d   : > { %s2090_s3 = sld [smem:[#allocation26_spill]]  ;;  %p1340_p11 = scmp.ne.s32.totalorder %s226_s14, %s1339_s13 }
  0x2e   : > { %p1347_p3 = scmp.lt.s32.totalorder %s226_s14, %s226_s14  ;;  %p1348_p5 = scmp.lt.s32.totalorder %s1339_s13, %s1339_s13 }
  0x2f   : > { %p1342_p13 = pnand %p1340_p11, %p1315_p12 }
  0x30   : > { %p1349_p7 = por %p1348_p5, %p1347_p3 }
  0x31   : > { %p1343_p0 = pneg %p1342_p13 }
  0x32   : > { %1085 = dma.hbm_to_smem (!%p1622_p10), %s2089_s0, 16, %s1508_s17, [#allocation7]  }
  0x33   : > { %s247_s12 = sshll.u32 %s2090_s3, 4  ;;  %p1350_p9 = pnand %p1349_p7, %p1343_p0  ;;  %s248_s12 = int_to_ptr.vmem [resolvable:$true] %s247_s12 }
  0x35   : > { %1353 = shalt.err (!%p1350_p9)
}
  0x36   : > { %s1509_s9 = smov [#allocation9]   ;;  %s1354_s15 = scalar_lea.vmem %s248_s12, 16 }
  0x37   : > { %1088 = dma.vmem_to_smem (!%p1622_p10), %s226_s14, 16, %s1509_s9, [#allocation8]  }
  0x38   : > { %p1355_p6 = scmp.ne.s32.totalorder %s248_s12, %s1354_s15  ;;  %p1362_p8 = scmp.lt.s32.totalorder %s248_s12, %s248_s12 }
  0x39   : > { %p1363_p11 = scmp.lt.s32.totalorder %s1354_s15, %s1354_s15 }
  0x3a   : > { %p1357_p4 = pnand %p1355_p6, %p1315_p12 }
  0x3b   : > { %p1364_p13 = por %p1363_p11, %p1362_p8 }
  0x3c   : > { %p1358_p1 = pneg %p1357_p4 }
  0x3e   : > { %p1365_p2 = pnand %p1364_p13, %p1358_p1 }
  0x40   : > { %1368 = shalt.err (!%p1365_p2)
}
  0x41   : > { %s1510_s16 = smov [#allocation12]   ;;  %s39_s14 = sadd.s32 1, %s1497_s23 }
  0x42   : > { %1094 = dma.vmem_to_smem (!%p1622_p10), %s248_s12, 16, %s1510_s16, [#allocation11]  }
  0x43   : > { %s50_s17 = sadd.s32 1, %s1501_s24  ;;  %p40_p1 = scmp.ge.s32.totalorder %s39_s14, 2 }
  0x44   : > { %s147_s26 = sadd.s32 1, %s1485_s20  ;;  %p154_p2 = scmp.ne.s32.totalorder %s1485_s20, %s1481_s19 }
  0x45   : > { %p155_p4 = scmp.eq.s32.totalorder %s1505_s25, 0  ;;  %s2112_s14 = smov (%p40_p1, %s39_s14), 0 }
  0x46   : > { %2091 = sst [smem:[#allocation22_spill]] %s2112_s14  ;;  %s2114_s17 = smov (!%p40_p1, %s50_s17), %s1501_s24 }
  0x47   : > { %s138_s11 = ssub.s32 %s1497_s23, %s2112_s14  ;;  %p1665_p6 = por %p155_p4, %p154_p2 }
  0x48   : > { %p52_p8 = scmp.ge.s32.totalorder %s2114_s17, 4  ;;  %p2093_p10 = scmp.ne.s32.totalorder %s2081_s29, 0 }
  0x49   : > { %p1107_p0 = scmp.lt.s32.totalorder %s1505_s25, 8  ;;  %s258_s8 = sand.u32 1, %s1485_s20  }
  0x4a   : > { %p1671_p12 = por %p2093_p10, %p154_p2  ;;  %s2116_s17 = smov (%p52_p8, %s2114_s17), 0 }
  0x4b   : > { %s1012_s12 = sshll.u32 %s258_s8, 7  ;;  %s139_s13 = ssub.s32 %s1501_s24, %s2116_s17 }
  0x4c   : > { %s140_s9 = sor.u32 %s139_s13, %s138_s11  ;;  %s1013_s15 = sshll.u32 %s1501_s24, 4 }
  0x4d   : > { %p145_p3 = scmp.eq.s32.totalorder %s140_s9, 0  ;;  %s1014_s16 = sshll.u32 %s1497_s23, 6 }
  0x4e   : > { %s271_s0 = sadd.s32 %s1014_s16, %s1013_s15  ;;  %s262_s1 = scalar_lea.vmem [#allocation13], %s1012_s12 }
  0x4f   : > { %s274_s29 = sshll.u32 %s262_s1, 4  ;;  %s1015_s3 = sshll.u32 %s271_s0, 7  ;;  %s275_s29 = int_to_ptr.vmem [resolvable:$true] %s274_s29 }
  0x50   : > { %s1684_s2 = scalar_select %p145_p3, %s1485_s20, %s147_s26  }
  0x51   : > { %s273_s18 = scalar_lea.hbm %s2064_s4, %s1015_s3  ;;  %p1693_p5 = pnand %p1107_p0, %p1665_p6 }
  0x52   : > { %s259_s11 = scalar_lea.sflag [#allocation5], %s258_s8  ;;  %s1382_s12 = scalar_lea.vmem %s275_s29, 2048 }
  0x53   : > { %p1371_p7 = pneg %p1693_p5  ;;  %p1383_p9 = scmp.ne.s32.totalorder %s275_s29, %s1382_s12 }
  0x54   : > { %s1511_s0 = smov [#allocation13]  }
  0x55   : > { %p1385_p11 = pnand %p1383_p9, %p1371_p7  ;;  %s1387_s1 = sshll.u32 %s1511_s0, 4  ;;  %s1388_s1 = int_to_ptr.vmem [resolvable:$false] %s1387_s1 }
  0x56   : > { %s1389_s26 = scalar_lea.vmem %s1388_s1, 4096  ;;  %p1390_p1 = scmp.lt.s32.totalorder %s275_s29, %s1388_s1 }
  0x57   : > { %p1386_p13 = pneg %p1385_p11  ;;  %p1391_p2 = scmp.lt.s32.totalorder %s1389_s26, %s1382_s12 }
  0x59   : > { %p1392_p4 = por %p1391_p2, %p1390_p1 }
  0x5b   : > { %p1393_p8 = pnand %p1392_p4, %p1386_p13 }
  0x5d   : > { %1396 = shalt.err (!%p1393_p8)
}
  0x5e   : > { %s1512_s3 = smov 128   ;;  %s1513_s6 = smov 8  }
  0x5f   : > { %1098 = dma.hbm_to_vmem [thread:$0]  (!%p1693_p5), %s273_s18, 2048, %s275_s29, %s259_s11, %s1512_s3, %s1512_s3, %s1513_s6  }
  0x60   : > { %p2096_p6 = scmp.ne.s32.totalorder %s2086_s10, 0 }
  0x61   : > { %p2097_p10 = scmp.ne.s32.totalorder (!%p2096_p6), %s2080_s28, 0 }
  0x62   : > { %286 = sbr.rel (%p2096_p6) target bundleno = 276 (0x114), region = 40 }
  0x67   : > { %1456 = dma.done.wait (%p2097_p10), [#allocation7], 16  }
  0x68   : > { %1458 = vsyncadd (%p2097_p10), [#allocation7], 4294967280 }
  0x69   : > { %1460 = dma.done.wait (%p2097_p10), [#allocation8], 16  }
  0x6a   : > { %1462 = vsyncadd (%p2097_p10), [#allocation8], 4294967280 }
  0x6b   : > { %1464 = dma.done.wait (%p2097_p10), [#allocation11], 32  }
  0x6c   : > { %1466 = vsyncadd (%p2097_p10), [#allocation11], 4294967264  ;;  %s1716_s5 = sand.u32 1, %s1481_s19   ;;  %p2098_p0 = scmp.ne.s32.totalorder %s2082_s30, 0 }
  0x6d   : > { %s1021_s18 = sshll.u32 %s1716_s5, 7  ;;  %s305_s10 = scalar_lea.sflag [#allocation5], %s1716_s5 }
  0x6e   : > { %s1720_s14 = scalar_lea.vmem [#allocation13], %s1021_s18 }
  0x6f   : > { %1468 = dma.done.wait (%p2098_p0), %s305_s10, 2048  }
  0x70   : > { %1470 = vsyncadd (%p2098_p0), %s305_s10, 4294965248 }
  0x71   : > { %313 = sfence }
  0x72   : > { %s1726_s27 = scalar_lea.vmem [#allocation14], %s1021_s18  ;;  %p1023_p3 = scmp.ne.s32.totalorder %s1489_s21, 0 }
  0x73   : > { %s1759_s28 = sld [smem:[#allocation4 + %s1493_s22]] (!%p1023_p3) }
  0x74   : > { %341 = sbr.rel (%p1023_p3) target bundleno = 241 (0xf1), region = 64  ;;  %s1766_s30 = sld [smem:[#allocation9 + %s1493_s22]] (!%p1023_p3) }
  0x75   : > { %s1771_s8 = sld [smem:[#allocation10 + %s1493_s22]] (!%p1023_p3) }
  0x76   : > { %s1843_s9 = sld [smem:[#allocation12 + %s1493_s22]] (!%p1023_p3) }
  0x79   : > { %v346_v0 = vlaneseq  ;;  %v1789_v50 = vstv %s1759_s28 }
  0x7a   : > { %s579_s13 = ssub.f32 0.0, %s1766_s30 }
  0x7b   : > { %v1729_v1 = vshrl.u32 %v346_v0, 7  ;;  %v1731_v2 = vand.u32 127, %v346_v0  ;;  %v1793_v53 = vstv %s1771_s8 }
  0x7c   : > { %s678_s15 = ssub.f32 0.0, %s1843_s9 }
  0x7d   : > { %v386_v3 = vsub.s32 %v1729_v1, %v1731_v2  ;;  %v348_v4 = vadd.s32 8, %v1729_v1  ;;  %v349_v5 = vadd.s32 16, %v1729_v1  ;;  %v350_v6 = vadd.s32 24, %v1729_v1 }
  0x7e   : > { %v351_v7 = vadd.s32 32, %v1729_v1  ;;  %v352_v8 = vadd.s32 40, %v1729_v1  ;;  %v353_v18 = vadd.s32 48, %v1729_v1  ;;  %v354_v23 = vadd.s32 56, %v1729_v1 }
  0x7f   : > { %vm402_vm0 = vcmp.gt.s32.totalorder %v386_v3, 0  ;;  %v1024_v9 = vcvt.s32.f32 %v386_v3  ;;  %v387_v10 = vsub.s32 %v348_v4, %v1731_v2  ;;  %v388_v11 = vsub.s32 %v349_v5, %v1731_v2 }
  0x80   : > { %v389_v12 = vsub.s32 %v350_v6, %v1731_v2  ;;  %v390_v13 = vsub.s32 %v351_v7, %v1731_v2  ;;  %v391_v17 = vsub.s32 %v352_v8, %v1731_v2  ;;  %v392_v31 = vsub.s32 %v353_v18, %v1731_v2 }
  0x81   : > { %v1744_v14 = vsel %vm402_vm0, %v1024_v9, 0.0  ;;  %vm404_vm1 = vcmp.gt.s32.totalorder %v387_v10, 0  ;;  %v1026_v15 = vcvt.s32.f32 %v387_v10  ;;  %vm406_vm2 = vcmp.gt.s32.totalorder %v388_v11, 0 }
  0x82   : > { %v466_v16 = vmax.f32 %v1744_v14, 1.0  ;;  %v1028_v20 = vcvt.s32.f32 %v388_v11  ;;  %vm408_vm3 = vcmp.gt.s32.totalorder %v389_v12, 0  ;;  %v1030_v21 = vcvt.s32.f32 %v389_v12 }
  0x83   : > { %v1749_v19 = vsel %vm404_vm1, %v1026_v15, 0.0  ;;  %vm410_vm4 = vcmp.gt.s32.totalorder %v390_v13, 0  ;;  %v1032_v26 = vcvt.s32.f32 %v390_v13  ;;  %vm412_vm5 = vcmp.gt.s32.totalorder %v391_v17, 0 }
  0x84   : > { %1185 = vlog2.f32 %v466_v16  ;;  %v467_v22 = vmax.f32 %v1749_v19, 1.0  ;;  %v1753_v24 = vsel %vm406_vm2, %v1028_v20, 0.0  ;;  %v1755_v25 = vsel %vm408_vm3, %v1030_v21, 0.0 }
  0x85   : > { %v468_v27 = vmax.f32 %v1753_v24, 1.0  ;;  %v469_v28 = vmax.f32 %v1755_v25, 1.0  ;;  %v1762_v29 = vsel %vm410_vm4, %v1032_v26, 0.0  ;;  %v1034_v30 = vcvt.s32.f32 %v391_v17 }
  0x86   : > { %1187 = vlog2.f32 %v467_v22  ;;  %v470_v32 = vmax.f32 %v1762_v29, 1.0  ;;  %v393_v33 = vsub.s32 %v354_v23, %v1731_v2  ;;  %vm414_vm6 = vcmp.gt.s32.totalorder %v392_v31, 0 }
  0x87   : > { %1189 = vlog2.f32 %v468_v27  ;;  %v1773_v34 = vsel %vm412_vm5, %v1034_v30, 0.0  ;;  %v1036_v35 = vcvt.s32.f32 %v392_v31  ;;  %v355_v39 = vadd.s32 64, %v1729_v1 }
  0x88   : > { %1191 = vlog2.f32 %v469_v28  ;;  %v471_v36 = vmax.f32 %v1773_v34, 1.0  ;;  %vm416_vm7 = vcmp.gt.s32.totalorder %v393_v33, 0  ;;  %v1038_v38 = vcvt.s32.f32 %v393_v33 }
  0x89   : > { %1193 = vlog2.f32 %v470_v32  ;;  %v1776_v37 = vsel %vm414_vm6, %v1036_v35, 0.0  ;;  %v356_v40 = vadd.s32 72, %v1729_v1  ;;  %v357_v42 = vadd.s32 80, %v1729_v1 }
  0x8a   : > { %v472_v41 = vmax.f32 %v1776_v37, 1.0  ;;  %1195 = vlog2.f32 %v471_v36  ;;  %v1782_v43 = vsel %vm416_vm7, %v1038_v38, 0.0  ;;  %v394_v44 = vsub.s32 %v355_v39, %v1731_v2 }
  0x8b   : > { %v395_v45 = vsub.s32 %v356_v40, %v1731_v2  ;;  %v473_v46 = vmax.f32 %v1782_v43, 1.0  ;;  %v396_v47 = vsub.s32 %v357_v42, %v1731_v2  ;;  %v358_v56 = vadd.s32 88, %v1729_v1 }
  0x8c   : > { %1197 = vlog2.f32 %v472_v41  ;;  %vm418_vm8 = vcmp.gt.s32.totalorder %v394_v44, 0  ;;  %v1040_v48 = vcvt.s32.f32 %v394_v44  ;;  %v1806_v4 = vstv %s579_s13 }
  0x8d   : > { %vm420_vm9 = vcmp.gt.s32.totalorder %v395_v45, 0  ;;  %v1042_v49 = vcvt.s32.f32 %v395_v45  ;;  %1199 = vlog2.f32 %v473_v46  ;;  %vm422_vm10 = vcmp.gt.s32.totalorder %v396_v47, 0 }
  0x8e   : > { %v1044_v51 = vcvt.s32.f32 %v396_v47  ;;  %v1795_v54 = vsel %vm418_vm8, %v1040_v48, 0.0  ;;  %v397_v6 = vsub.s32 %v358_v56, %v1731_v2  ;;  %v359_v11 = vadd.s32 96, %v1729_v1 }
  0x8f   : > { %v1797_v55 = vsel %vm420_vm9, %v1042_v49, 0.0  ;;  %v474_v58 = vmax.f32 %v1795_v54, 1.0  ;;  %v360_v26 = vadd.s32 104, %v1729_v1  ;;  %vm450_vm12 = vcmp.gt.f32.partialorder %v1744_v14, 0.0 }
  0x90   : > { %v475_v60 = vmax.f32 %v1797_v55, 1.0  ;;  %v1802_v61 = vsel %vm422_vm10, %v1044_v51, 0.0  ;;  %vm424_vm11 = vcmp.gt.s32.totalorder %v397_v6, 0  ;;  %v1046_v39 = vcvt.s32.f32 %v397_v6 }
  0x91   : > { %v1186_v52 = vpop.eup %1185  ;;  %1201 = vlog2.f32 %v474_v58  ;;  %v476_v5 = vmax.f32 %v1802_v61, 1.0  ;;  %v398_v47 = vsub.s32 %v359_v11, %v1731_v2  ;;  %vm451_vm13 = vcmp.gt.f32.partialorder %v1749_v19, 0.0 }
  0x92   : > { %v483_v57 = vmul.f32 0.6931472, %v1186_v52  ;;  %1203 = vlog2.f32 %v475_v60  ;;  %vm452_vm14 = vcmp.gt.f32.partialorder %v1753_v24, 0.0  ;;  %vm453_vm0 = vcmp.gt.f32.partialorder %v1755_v25, 0.0 }
  0x93   : > { %v1188_v59 = vpop.eup %1187  ;;  %1205 = vlog2.f32 %v476_v5  ;;  %vm426_vm15 = vcmp.gt.s32.totalorder %v398_v47, 0  ;;  %v1048_v11 = vcvt.s32.f32 %v398_v47  ;;  %vm454_vm1 = vcmp.gt.f32.partialorder %v1762_v29, 0.0 }
  0x94   : > { %v515_v62 = vmul.f32 %v1789_v50, %v483_v57  ;;  %v614_v63 = vmul.f32 %v1793_v53, %v483_v57  ;;  %v485_v0 = vmul.f32 0.6931472, %v1188_v59  ;;  %v1190_v3 = vpop.eup %1189  ;;  %vm455_vm2 = vcmp.gt.f32.partialorder %v1773_v34, 0.0 }
  0x95   : > { %v1192_v7 = vpop.eup %1191  ;;  %v487_v15 = vmul.f32 0.6931472, %v1190_v3  ;;  %v1831_v3 = vsel %vm424_vm11, %v1046_v39, 0.0  ;;  %vm456_vm3 = vcmp.gt.f32.partialorder %v1776_v37, 0.0  ;;  %vm457_vm5 = vcmp.gt.f32.partialorder %v1782_v43, 0.0 }
  0x96   : > { %v531_v8 = vmul.f32 1.442695, %v515_v62  ;;  %v516_v9 = vmul.f32 %v1789_v50, %v485_v0  ;;  %v615_v10 = vmul.f32 %v1793_v53, %v485_v0  ;;  %v1194_v12 = vpop.eup %1193  ;;  %v630_v13 = vmul.f32 1.442695, %v614_v63 }
  0x97   : > { %v489_v16 = vmul.f32 0.6931472, %v1192_v7  ;;  %v491_v20 = vmul.f32 0.6931472, %v1194_v12  ;;  %v517_v21 = vmul.f32 %v1789_v50, %v487_v15  ;;  %v616_v22 = vmul.f32 %v1793_v53, %v487_v15  ;;  %v1196_v27 = vpop.eup %1195 }
  0x98   : > { %1207 = vpow2.f32 %v531_v8  ;;  %v533_v17 = vmul.f32 1.442695, %v516_v9  ;;  %v632_v18 = vmul.f32 1.442695, %v615_v10  ;;  %v493_v42 = vmul.f32 0.6931472, %v1196_v27 }
  0x99   : > { %v518_v23 = vmul.f32 %v1789_v50, %v489_v16  ;;  %v617_v28 = vmul.f32 %v1793_v53, %v489_v16  ;;  %v519_v30 = vmul.f32 %v1789_v50, %v491_v20  ;;  %v618_v31 = vmul.f32 %v1793_v53, %v491_v20  ;;  %v1198_v32 = vpop.eup %1197 }
  0x9a   : > { %1209 = vpow2.f32 %v533_v17  ;;  %v535_v33 = vmul.f32 1.442695, %v517_v21  ;;  %v634_v35 = vmul.f32 1.442695, %v616_v22  ;;  %v1200_v40 = vpop.eup %1199  ;;  %v495_v44 = vmul.f32 0.6931472, %v1198_v32 }
  0x9b   : > { %1211 = vpow2.f32 %v630_v13  ;;  %v537_v36 = vmul.f32 1.442695, %v518_v23  ;;  %v636_v38 = vmul.f32 1.442695, %v617_v28  ;;  %v539_v41 = vmul.f32 1.442695, %v519_v30 }
  0x9c   : > { %1213 = vpow2.f32 %v632_v18  ;;  %v638_v45 = vmul.f32 1.442695, %v618_v31  ;;  %v497_v46 = vmul.f32 0.6931472, %v1200_v40  ;;  %v520_v48 = vmul.f32 %v1789_v50, %v493_v42 }
  0x9d   : > { %1215 = vpow2.f32 %v535_v33  ;;  %v619_v49 = vmul.f32 %v1793_v53, %v493_v42  ;;  %v521_v51 = vmul.f32 %v1789_v50, %v495_v44  ;;  %v620_v52 = vmul.f32 %v1793_v53, %v495_v44 }
  0x9e   : > { %1217 = vpow2.f32 %v634_v35  ;;  %v522_v56 = vmul.f32 %v1789_v50, %v497_v46  ;;  %v621_v57 = vmul.f32 %v1793_v53, %v497_v46  ;;  %v1202_v58 = vpop.eup %1201  ;;  %v541_v59 = vmul.f32 1.442695, %v520_v48 }
  0x9f   : > { %1219 = vpow2.f32 %v537_v36  ;;  %v640_v60 = vmul.f32 1.442695, %v619_v49  ;;  %v543_v62 = vmul.f32 1.442695, %v521_v51  ;;  %v1204_v63 = vpop.eup %1203  ;;  %v642_v0 = vmul.f32 1.442695, %v620_v52 }
  0xa0   : > { %1221 = vpow2.f32 %v636_v38  ;;  %v545_v5 = vmul.f32 1.442695, %v522_v56  ;;  %v499_v7 = vmul.f32 0.6931472, %v1202_v58  ;;  %v501_v8 = vmul.f32 0.6931472, %v1204_v63  ;;  %v1206_v9 = vpop.eup %1205 }
  0xa1   : > { %1223 = vpow2.f32 %v539_v41  ;;  %v644_v10 = vmul.f32 1.442695, %v621_v57  ;;  %v399_v12 = vsub.s32 %v360_v26, %v1731_v2  ;;  %v503_v20 = vmul.f32 0.6931472, %v1206_v9 }
  0xa2   : > { %1225 = vpow2.f32 %v638_v45  ;;  %v523_v6 = vmul.f32 %v1789_v50, %v499_v7  ;;  %v622_v15 = vmul.f32 %v1793_v53, %v499_v7  ;;  %v524_v16 = vmul.f32 %v1789_v50, %v501_v8 }
  0xa3   : > { %1227 = vpow2.f32 %v541_v59  ;;  %v623_v18 = vmul.f32 %v1793_v53, %v501_v8  ;;  %v477_v26 = vmax.f32 %v1831_v3, 1.0  ;;  %v1852_v36 = vsel %vm426_vm15, %v1048_v11, 0.0 }
  0xa4   : > { %1229 = vpow2.f32 %v640_v60  ;;  %v547_v23 = vmul.f32 1.442695, %v523_v6  ;;  %v646_v30 = vmul.f32 1.442695, %v622_v15  ;;  %v549_v31 = vmul.f32 1.442695, %v524_v16 }
  0xa5   : > { %v1208_v13 = vpop.eup %1207  ;;  %1231 = vpow2.f32 %v543_v62  ;;  %v648_v35 = vmul.f32 1.442695, %v623_v18  ;;  %v525_v39 = vmul.f32 %v1789_v50, %v503_v20  ;;  %v624_v40 = vmul.f32 %v1793_v53, %v503_v20 }
  0xa6   : > { %v563_v17 = vsel %vm450_vm12, %v1208_v13, 0.0  ;;  %1233 = vpow2.f32 %v642_v0  ;;  %vm428_vm4 = vcmp.gt.s32.totalorder %v399_v12, 0  ;;  %v1050_v44 = vcvt.s32.f32 %v399_v12 }
  0xa7   : > { %v1210_v21 = vpop.eup %1209  ;;  %v581_v22 = vmul.f32 %v1806_v4, %v563_v17  ;;  %1235 = vpow2.f32 %v545_v5  ;;  %v361_v45 = vadd.s32 112, %v1729_v1  ;;  %v551_v48 = vmul.f32 1.442695, %v525_v39 }
  0xa8   : > { %v1212_v27 = vpop.eup %1211  ;;  %v564_v28 = vsel %vm451_vm13, %v1210_v21, 0.0  ;;  %1237 = vpow2.f32 %v644_v10  ;;  %v478_v49 = vmax.f32 %v1852_v36, 1.0  ;;  %v1866_v56 = vsel %vm428_vm4, %v1050_v44, 0.0 }
  0xa9   : > { %v1214_v32 = vpop.eup %1213  ;;  %597 = vst [vmem:[#allocation3 + $0x28] sm:$0xff] %v581_v22  ;;  %v582_v33 = vmul.f32 %v1806_v4, %v564_v28  ;;  %1239 = vpow2.f32 %v547_v23  ;;  %vm458_vm6 = vcmp.gt.f32.partialorder %v1795_v54, 0.0  ;;  %v650_v59 = vmul.f32 1.442695, %v624_v40 }
  0xaa   : > { %v1216_v38 = vpop.eup %1215  ;;  %1241 = vpow2.f32 %v646_v30  ;;  %v662_v62 = vsel %vm450_vm12, %v1212_v27, 0.0  ;;  %v479_v0 = vmax.f32 %v1866_v56, 1.0  ;;  %v400_v5 = vsub.s32 %v361_v45, %v1731_v2 }
  0xab   : > { %v1218_v41 = vpop.eup %1217  ;;  %598 = vst [vmem:[#allocation3 + $0x68] sm:$0xff] %v582_v33  ;;  %v565_v42 = vsel %vm452_vm14, %v1216_v38, 0.0  ;;  %1243 = vpow2.f32 %v549_v31  ;;  %v663_v8 = vsel %vm451_vm13, %v1214_v32, 0.0  ;;  %vm459_vm7 = vcmp.gt.f32.partialorder %v1797_v55, 0.0 }
  0xac   : > { %v1220_v46 = vpop.eup %1219  ;;  %v583_v47 = vmul.f32 %v1806_v4, %v565_v42  ;;  %1245 = vpow2.f32 %v648_v35  ;;  %v362_v14 = vadd.s32 120, %v1729_v1  ;;  %vm430_vm8 = vcmp.gt.s32.totalorder %v400_v5, 0 }
  0xad   : > { %v1222_v51 = vpop.eup %1221  ;;  %v566_v52 = vsel %vm453_vm0, %v1220_v46, 0.0  ;;  %1247 = vlog2.f32 %v477_v26  ;;  %v1052_v12 = vcvt.s32.f32 %v400_v5  ;;  %v1886_v15 = vstv %s678_s15 }
  0xae   : > { %v1224_v57 = vpop.eup %1223  ;;  %599 = vst [vmem:[#allocation3 + $0x10] sm:$0xff] %v583_v47  ;;  %v584_v58 = vmul.f32 %v1806_v4, %v566_v52  ;;  %1249 = vpow2.f32 %v551_v48  ;;  %v401_v6 = vsub.s32 %v362_v14, %v1731_v2  ;;  %vm460_vm9 = vcmp.gt.f32.partialorder %v1802_v61, 0.0 }
  0xaf   : > { %v1226_v60 = vpop.eup %1225  ;;  %v567_v63 = vsel %vm454_vm1, %v1224_v57, 0.0  ;;  %1251 = vlog2.f32 %v478_v49  ;;  %v1891_v17 = vsel %vm430_vm8, %v1052_v12, 0.0  ;;  %v680_v18 = vmul.f32 %v1886_v15, %v662_v62 }
  0xb0   : > { %v1228_v7 = vpop.eup %1227  ;;  %600 = vst [vmem:[#allocation3 + $0x40] sm:$0xff] %v584_v58  ;;  %v585_v9 = vmul.f32 %v1806_v4, %v567_v63  ;;  %1253 = vlog2.f32 %v479_v0  ;;  %v681_v20 = vmul.f32 %v1886_v15, %v663_v8  ;;  %v664_v22 = vsel %vm452_vm14, %v1218_v41, 0.0 }
  0xb1   : > { %v1230_v10 = vpop.eup %1229  ;;  %v568_v11 = vsel %vm455_vm2, %v1228_v7, 0.0  ;;  %1255 = vpow2.f32 %v650_v59  ;;  %v665_v2 = vsel %vm453_vm0, %v1222_v51, 0.0  ;;  %v480_v26 = vmax.f32 %v1891_v17, 1.0 }
  0xb2   : > { %v1232_v13 = vpop.eup %1231  ;;  %601 = vst [vmem:[#allocation3 + $0x48] sm:$0xff] %v585_v9  ;;  %v586_v19 = vmul.f32 %v1806_v4, %v568_v11  ;;  %vm432_vm10 = vcmp.gt.s32.totalorder %v401_v6, 0  ;;  %v1054_v30 = vcvt.s32.f32 %v401_v6  ;;  %v696_v31 = vmul.f32 1.442695, %v680_v18 }
  0xb3   : > { %v1234_v16 = vpop.eup %1233  ;;  %v569_v1 = vsel %vm456_vm3, %v1232_v13, 0.0  ;;  %v666_v24 = vsel %vm454_vm1, %v1226_v60, 0.0  ;;  %1257 = vlog2.f32 %v480_v26  ;;  %v698_v33 = vmul.f32 1.442695, %v681_v20 }
  0xb4   : > { %v1236_v21 = vpop.eup %1235  ;;  %602 = vst [vmem:[#allocation3 + $0x30] sm:$0xff] %v586_v19  ;;  %v587_v23 = vmul.f32 %v1806_v4, %v569_v1  ;;  %v1908_v39 = vsel %vm432_vm10, %v1054_v30, 0.0  ;;  %1259 = vpow2.f32 %v696_v31  ;;  %v682_v40 = vmul.f32 %v1886_v15, %v664_v22 }
  0xb5   : > { %v1238_v27 = vpop.eup %1237  ;;  %v570_v28 = vsel %vm457_vm5, %v1236_v21, 0.0  ;;  %v667_v42 = vsel %vm455_vm2, %v1230_v10, 0.0  ;;  %v668_v29 = vsel %vm456_vm3, %v1234_v16, 0.0  ;;  %v481_v45 = vmax.f32 %v1908_v39, 1.0 }
  0xb6   : > { %v1240_v32 = vpop.eup %1239  ;;  %603 = vst [vmem:[#allocation3 + $0x70] sm:$0xff] %v587_v23  ;;  %v588_v25 = vmul.f32 %v1806_v4, %v570_v28  ;;  %1261 = vpow2.f32 %v698_v33  ;;  %v700_v48 = vmul.f32 1.442695, %v682_v40  ;;  %v683_v49 = vmul.f32 %v1886_v15, %v665_v2 }
  0xb7   : > { %v1242_v35 = vpop.eup %1241  ;;  %v571_v38 = vsel %vm458_vm6, %v1240_v32, 0.0  ;;  %v669_v34 = vsel %vm457_vm5, %v1238_v27, 0.0  ;;  %1263 = vlog2.f32 %v481_v45  ;;  %v684_v52 = vmul.f32 %v1886_v15, %v666_v24 }
  0xb8   : > { %v1244_v41 = vpop.eup %1243  ;;  %604 = vst [vmem:[#allocation3 + $0x38] sm:$0xff] %v588_v25  ;;  %v589_v44 = vmul.f32 %v1806_v4, %v571_v38  ;;  %1265 = vpow2.f32 %v700_v48  ;;  %v702_v59 = vmul.f32 1.442695, %v683_v49  ;;  %v685_v60 = vmul.f32 %v1886_v15, %v667_v42 }
  0xb9   : > { %v1246_v46 = vpop.eup %1245  ;;  %v572_v47 = vsel %vm459_vm7, %v1244_v41, 0.0  ;;  %v670_v62 = vsel %vm458_vm6, %v1242_v35, 0.0  ;;  %v704_v63 = vmul.f32 1.442695, %v684_v52  ;;  %v686_v0 = vmul.f32 %v1886_v15, %v668_v29 }
  0xba   : > { %v1248_v51 = vpop.eup %1247  ;;  %605 = vst [vmem:[#allocation3 + $0x20] sm:$0xff] %v589_v44  ;;  %v590_v37 = vmul.f32 %v1806_v4, %v572_v47  ;;  %v671_v7 = vsel %vm459_vm7, %v1246_v46, 0.0  ;;  %1267 = vpow2.f32 %v702_v59  ;;  %v706_v11 = vmul.f32 1.442695, %v685_v60 }
  0xbb   : > { %v1250_v57 = vpop.eup %1249  ;;  %v505_v58 = vmul.f32 0.6931472, %v1248_v51  ;;  %v708_v12 = vmul.f32 1.442695, %v686_v0  ;;  %1269 = vpow2.f32 %v704_v63  ;;  %v687_v18 = vmul.f32 %v1886_v15, %v669_v34 }
  0xbc   : > { %606 = vst [vmem:[#allocation3 + $0x78] sm:$0xff] %v590_v37  ;;  %v573_v43 = vsel %vm460_vm9, %v1250_v57, 0.0  ;;  %v1252_v5 = vpop.eup %1251  ;;  %1271 = vpow2.f32 %v706_v11  ;;  %v688_v22 = vmul.f32 %v1886_v15, %v670_v62  ;;  %v689_v31 = vmul.f32 %v1886_v15, %v671_v7 }
  0xbd   : > { %v591_v8 = vmul.f32 %v1806_v4, %v573_v43  ;;  %v526_v9 = vmul.f32 %v1789_v50, %v505_v58  ;;  %v625_v14 = vmul.f32 %v1793_v53, %v505_v58  ;;  %v1254_v10 = vpop.eup %1253  ;;  %v507_v54 = vmul.f32 0.6931472, %v1252_v5 }
  0xbe   : > { %v1256_v13 = vpop.eup %1255  ;;  %v509_v16 = vmul.f32 0.6931472, %v1254_v10  ;;  %v710_v25 = vmul.f32 1.442695, %v687_v18  ;;  %v712_v33 = vmul.f32 1.442695, %v688_v22 }
  0xbf   : > { %607 = vst [vmem:[#allocation3 + $0x18] sm:$0xff] %v591_v8  ;;  %v553_v19 = vmul.f32 1.442695, %v526_v9  ;;  %v652_v6 = vmul.f32 1.442695, %v625_v14  ;;  %v527_v55 = vmul.f32 %v1789_v50, %v507_v54  ;;  %v626_v1 = vmul.f32 %v1793_v53, %v507_v54 }
  0xc0   : > { %v528_v20 = vmul.f32 %v1789_v50, %v509_v16  ;;  %v627_v21 = vmul.f32 %v1793_v53, %v509_v16  ;;  %v672_v2 = vsel %vm460_vm9, %v1256_v13, 0.0  ;;  %v1258_v27 = vpop.eup %1257  ;;  %v714_v42 = vmul.f32 1.442695, %v689_v31 }
  0xc1   : > { %1273 = vpow2.f32 %v553_v19  ;;  %v555_v23 = vmul.f32 1.442695, %v527_v55  ;;  %v654_v26 = vmul.f32 1.442695, %v626_v1  ;;  %v1260_v32 = vpop.eup %1259  ;;  %v511_v24 = vmul.f32 0.6931472, %v1258_v27 }
  0xc2   : > { %1275 = vpow2.f32 %v652_v6  ;;  %v557_v28 = vmul.f32 1.442695, %v528_v20  ;;  %v656_v30 = vmul.f32 1.442695, %v627_v21  ;;  %728 = vst [vmem:[#allocation2 + $0x30] sm:$0xff] %v1260_v32  ;;  %v690_v35 = vmul.f32 %v1886_v15, %v672_v2 }
  0xc3   : > { %1277 = vpow2.f32 %v708_v12  ;;  %v1262_v61 = vpop.eup %1261  ;;  %v529_v38 = vmul.f32 %v1789_v50, %v511_v24  ;;  %v628_v40 = vmul.f32 %v1793_v53, %v511_v24  ;;  %vm461_vm11 = vcmp.gt.f32.partialorder %v1831_v3, 0.0 }
  0xc4   : > { %1279 = vpow2.f32 %v555_v23  ;;  %v1264_v41 = vpop.eup %1263  ;;  %729 = vst [vmem:[#allocation2] sm:$0xff] %v1262_v61  ;;  %v716_v47 = vmul.f32 1.442695, %v690_v35  ;;  %vm462_vm12 = vcmp.gt.f32.partialorder %v1852_v36, 0.0  ;;  %vm463_vm13 = vcmp.gt.f32.partialorder %v1866_v56, 0.0 }
  0xc5   : > { %1281 = vpow2.f32 %v654_v26  ;;  %v1266_v29 = vpop.eup %1265  ;;  %v559_v44 = vmul.f32 1.442695, %v529_v38  ;;  %v658_v45 = vmul.f32 1.442695, %v628_v40  ;;  %v513_v46 = vmul.f32 0.6931472, %v1264_v41 }
  0xc6   : > { %1283 = vpow2.f32 %v557_v28  ;;  %730 = vst [vmem:[#allocation2 + $0x58] sm:$0xff] %v1266_v29  ;;  %vm464_vm14 = vcmp.gt.f32.partialorder %v1891_v17, 0.0  ;;  %vm465_vm15 = vcmp.gt.f32.partialorder %v1908_v39, 0.0 }
  0xc7   : > { %1285 = vpow2.f32 %v656_v30  ;;  %v530_v48 = vmul.f32 %v1789_v50, %v513_v46  ;;  %v629_v49 = vmul.f32 %v1793_v53, %v513_v46  ;;  %v1268_v51 = vpop.eup %1267 }
  0xc8   : > { %1287 = vpow2.f32 %v710_v25  ;;  %v1270_v34 = vpop.eup %1269  ;;  %731 = vst [vmem:[#allocation2 + $0x18] sm:$0xff] %v1268_v51 }
  0xc9   : > { %1289 = vpow2.f32 %v712_v33  ;;  %v561_v37 = vmul.f32 1.442695, %v530_v48  ;;  %v660_v52 = vmul.f32 1.442695, %v629_v49  ;;  %v1272_v57 = vpop.eup %1271  ;;  %732 = vst [vmem:[#allocation2 + $0x50] sm:$0xff] %v1270_v34 }
  0xca   : > { %1291 = vpow2.f32 %v559_v44  ;;  %733 = vst [vmem:[#allocation2 + $0x68] sm:$0xff] %v1272_v57 }
  0xcb   : > { %1293 = vpow2.f32 %v658_v45 }
  0xcc   : > { %1295 = vpow2.f32 %v714_v42 }
  0xcd   : > { %1297 = vpow2.f32 %v716_v47 }
  0xce   : > { %v1274_v58 = vpop.eup %1273  ;;  %1299 = vpow2.f32 %v561_v37 }
  0xcf   : > { %v1276_v59 = vpop.eup %1275  ;;  %v574_v60 = vsel %vm461_vm11, %v1274_v58, 0.0  ;;  %1301 = vpow2.f32 %v660_v52 }
  0xd0   : > { %v1278_v50 = vpop.eup %1277  ;;  %v592_v53 = vmul.f32 %v1806_v4, %v574_v60  ;;  %v673_v62 = vsel %vm461_vm11, %v1276_v59, 0.0 }
  0xd1   : > { %v1280_v43 = vpop.eup %1279  ;;  %734 = vst [vmem:[#allocation2 + $0x8] sm:$0xff] %v1278_v50  ;;  %v691_v63 = vmul.f32 %v1886_v15, %v673_v62 }
  0xd2   : > { %v1282_v0 = vpop.eup %1281  ;;  %608 = vst [vmem:[#allocation3 + $0x58] sm:$0xff] %v592_v53  ;;  %v575_v3 = vsel %vm462_vm12, %v1280_v43, 0.0 }
  0xd3   : > { %v1284_v5 = vpop.eup %1283  ;;  %v593_v7 = vmul.f32 %v1806_v4, %v575_v3  ;;  %v674_v8 = vsel %vm462_vm12, %v1282_v0, 0.0  ;;  %v718_v9 = vmul.f32 1.442695, %v691_v63 }
  0xd4   : > { %v1286_v14 = vpop.eup %1285  ;;  %v576_v10 = vsel %vm463_vm13, %v1284_v5, 0.0  ;;  %v692_v54 = vmul.f32 %v1886_v15, %v674_v8 }
  0xd5   : > { %v1288_v11 = vpop.eup %1287  ;;  %609 = vst [vmem:[#allocation3] sm:$0xff] %v593_v7  ;;  %v594_v36 = vmul.f32 %v1806_v4, %v576_v10  ;;  %v675_v12 = vsel %vm463_vm13, %v1286_v14, 0.0  ;;  %1303 = vpow2.f32 %v718_v9 }
  0xd6   : > { %v1290_v13 = vpop.eup %1289  ;;  %735 = vst [vmem:[#allocation2 + $0x48] sm:$0xff] %v1288_v11  ;;  %v720_v56 = vmul.f32 1.442695, %v692_v54  ;;  %v693_v19 = vmul.f32 %v1886_v15, %v675_v12 }
  0xd7   : > { %v1292_v6 = vpop.eup %1291  ;;  %610 = vst [vmem:[#allocation3 + $0x8] sm:$0xff] %v594_v36  ;;  %736 = vst [vmem:[#allocation2 + $0x40] sm:$0xff] %v1290_v13 }
  0xd8   : > { %v1294_v16 = vpop.eup %1293  ;;  %v577_v55 = vsel %vm464_vm14, %v1292_v6, 0.0  ;;  %1305 = vpow2.f32 %v720_v56  ;;  %v722_v1 = vmul.f32 1.442695, %v693_v19 }
  0xd9   : > { %v1296_v18 = vpop.eup %1295  ;;  %v595_v20 = vmul.f32 %v1806_v4, %v577_v55  ;;  %v676_v21 = vsel %vm464_vm14, %v1294_v16, 0.0 }
  0xda   : > { %v1298_v22 = vpop.eup %1297  ;;  %737 = vst [vmem:[#allocation2 + $0x20] sm:$0xff] %v1296_v18  ;;  %1307 = vpow2.f32 %v722_v1  ;;  %v694_v17 = vmul.f32 %v1886_v15, %v676_v21 }
  0xdb   : > { %v1300_v2 = vpop.eup %1299  ;;  %611 = vst [vmem:[#allocation3 + $0x60] sm:$0xff] %v595_v20  ;;  %738 = vst [vmem:[#allocation2 + $0x10] sm:$0xff] %v1298_v22 }
  0xdc   : > { %v1302_v23 = vpop.eup %1301  ;;  %v578_v26 = vsel %vm465_vm15, %v1300_v2, 0.0  ;;  %v724_v27 = vmul.f32 1.442695, %v694_v17 }
  0xdd   : > { %v596_v28 = vmul.f32 %v1806_v4, %v578_v26  ;;  %v677_v30 = vsel %vm465_vm15, %v1302_v23, 0.0 }
  0xde   : > { %1309 = vpow2.f32 %v724_v27  ;;  %v695_v31 = vmul.f32 %v1886_v15, %v677_v30 }
  0xdf   : > { %612 = vst [vmem:[#allocation3 + $0x50] sm:$0xff] %v596_v28 }
  0xe0   : > { %v726_v32 = vmul.f32 1.442695, %v695_v31 }
  0xe2   : > { %v1304_v24 = vpop.eup %1303  ;;  %1311 = vpow2.f32 %v726_v32 }
  0xe3   : > { %739 = vst [vmem:[#allocation2 + $0x38] sm:$0xff] %v1304_v24 }
  0xe5   : > { %v1306_v39 = vpop.eup %1305 }
  0xe6   : > { %740 = vst [vmem:[#allocation2 + $0x60] sm:$0xff] %v1306_v39 }
  0xe7   : > { %v1308_v25 = vpop.eup %1307 }
  0xe8   : > { %741 = vst [vmem:[#allocation2 + $0x70] sm:$0xff] %v1308_v25 }
  0xeb   : > { %v1310_v33 = vpop.eup %1309 }
  0xec   : > { %742 = vst [vmem:[#allocation2 + $0x78] sm:$0xff] %v1310_v33 }
  0xef   : > { %v1312_v35 = vpop.eup %1311 }
  0xf0   : > { %743 = vst [vmem:[#allocation2 + $0x28] sm:$0xff] %v1312_v35 }
  0xf1 PF: > { %v744_v4 = vld [vmem:[%s1720_s14] sm:$0xff]  ;;  %v760_v15 = vld [vmem:[#allocation2 + $0x30] sm:$0xff]  ;;  %v792_v61 = vld [vmem:[#allocation3 + $0x28] sm:$0xff]  ;;  %s1057_s16 = sshll.u32 %s1493_s22, 4  ;;  %s1058_s29 = sshll.u32 %s1489_s21, 6 }
  0xf2   : > { %v776_v38 = vmul.f32 %v760_v15, %v744_v4  ;;  %v745_v40 = vld [vmem:[%s1720_s14 + $0x8] sm:$0xff]  ;;  %v761_v41 = vld [vmem:[#allocation2] sm:$0xff]  ;;  %v746_v44 = vld [vmem:[%s1720_s14 + $0x10] sm:$0xff]  ;;  %s1987_s21 = sadd.s32 %s1058_s29, %s1057_s16  ;;  %s859_s22 = sshll.u32 %s1726_s27, 4  ;;  %s1999_s22 = int_to_ptr.vmem [resolvable:$true] %s859_s22 }
  0xf3   : > { %v793_v42 = vld [vmem:[#allocation3 + $0x68] sm:$0xff]  ;;  %v777_v29 = vmul.f32 %v761_v41, %v745_v40  ;;  %v762_v45 = vld [vmem:[#allocation2 + $0x58] sm:$0xff]  ;;  %v794_v46 = vld [vmem:[#allocation3 + $0x10] sm:$0xff]  ;;  %s1059_s11 = sshll.u32 %s1987_s21, 7  ;;  %s2099_s1 = sld [smem:[#allocation27_spill]] }
  0xf4   : > { %v808_v47 = vadd.f32 %v792_v61, %v776_v38  ;;  %v778_v48 = vmul.f32 %v762_v45, %v746_v44  ;;  %v747_v49 = vld [vmem:[%s1720_s14 + $0x18] sm:$0xff]  ;;  %v795_v34 = vld [vmem:[#allocation3 + $0x40] sm:$0xff]  ;;  %v764_v58 = vld [vmem:[#allocation2 + $0x50] sm:$0xff]  ;;  %s841_s3 = scalar_lea.sflag [#allocation6], %s1716_s5  ;;  %s1397_s6 = scalar_lea.vmem %s1999_s22, 2048 }
  0xf5   : > { %v763_v51 = vld [vmem:[#allocation2 + $0x18] sm:$0xff]  ;;  %v809_v37 = vadd.f32 %v793_v42, %v777_v29  ;;  %v748_v57 = vld [vmem:[%s1720_s14 + $0x20] sm:$0xff]  ;;  %v796_v59 = vld [vmem:[#allocation3 + $0x48] sm:$0xff]  ;;  %p1398_p5 = scmp.ne.s32.totalorder %s1999_s22, %s1397_s6  ;;  %s1514_s18 = smov [#allocation14]  }
  0xf6   : > { %v779_v52 = vmul.f32 %v763_v51, %v747_v49  ;;  %824 = vst [vmem:[%s1726_s27] sm:$0xff] %v808_v47  ;;  %v810_v60 = vadd.f32 %v794_v46, %v778_v48  ;;  %v780_v50 = vmul.f32 %v764_v58, %v748_v57  ;;  %v749_v53 = vld [vmem:[%s1720_s14 + $0x28] sm:$0xff]  ;;  %v797_v43 = vld [vmem:[#allocation3 + $0x30] sm:$0xff]  ;;  %v751_v14 = vld [vmem:[%s1720_s14 + $0x38] sm:$0xff]  ;;  %s1401_s10 = sshll.u32 %s1514_s18, 4  ;;  %s1402_s10 = int_to_ptr.vmem [resolvable:$false] %s1401_s10 }
  0xf7   : > { %v765_v62 = vld [vmem:[#allocation2 + $0x68] sm:$0xff]  ;;  %825 = vst [vmem:[%s1726_s27 + $0x8] sm:$0xff] %v809_v37  ;;  %v750_v3 = vld [vmem:[%s1720_s14 + $0x30] sm:$0xff]  ;;  %v799_v54 = vld [vmem:[#allocation3 + $0x38] sm:$0xff]  ;;  %p1399_p7 = pnand %p1398_p5, %p1671_p12  ;;  %p1404_p11 = scmp.lt.s32.totalorder %s1999_s22, %s1402_s10 }
  0xf8   : > { %v811_v63 = vadd.f32 %v795_v34, %v779_v52  ;;  %v781_v0 = vmul.f32 %v765_v62, %v749_v53  ;;  %v766_v5 = vld [vmem:[#allocation2 + $0x8] sm:$0xff]  ;;  %v798_v7 = vld [vmem:[#allocation3 + $0x70] sm:$0xff]  ;;  %826 = vst [vmem:[%s1726_s27 + $0x10] sm:$0xff] %v810_v60  ;;  %v812_v8 = vadd.f32 %v796_v59, %v780_v50  ;;  %v752_v12 = vld [vmem:[%s1720_s14 + $0x40] sm:$0xff] }
  0xf9   : > { %v782_v9 = vmul.f32 %v766_v5, %v750_v3  ;;  %v767_v10 = vld [vmem:[#allocation2 + $0x48] sm:$0xff]  ;;  %v768_v13 = vld [vmem:[#allocation2 + $0x40] sm:$0xff]  ;;  %v801_v1 = vld [vmem:[#allocation3 + $0x78] sm:$0xff]  ;;  %s2005_s26 = scalar_lea.hbm %s2099_s1, %s1059_s11  ;;  %p1400_p9 = pneg %p1399_p7 }
  0xfa   : > { %827 = vst [vmem:[%s1726_s27 + $0x18] sm:$0xff] %v811_v63  ;;  %v813_v11 = vadd.f32 %v797_v43, %v781_v0  ;;  %v783_v36 = vmul.f32 %v767_v10, %v751_v14  ;;  %v800_v56 = vld [vmem:[#allocation3 + $0x20] sm:$0xff]  ;;  %828 = vst [vmem:[%s1726_s27 + $0x20] sm:$0xff] %v812_v8  ;;  %v784_v6 = vmul.f32 %v768_v13, %v752_v12  ;;  %v753_v16 = vld [vmem:[%s1720_s14 + $0x48] sm:$0xff] }
  0xfb   : > { %v814_v19 = vadd.f32 %v798_v7, %v782_v9  ;;  %v769_v55 = vld [vmem:[#allocation2 + $0x20] sm:$0xff]  ;;  %v754_v21 = vld [vmem:[%s1720_s14 + $0x50] sm:$0xff]  ;;  %v802_v17 = vld [vmem:[#allocation3 + $0x18] sm:$0xff] }
  0xfc   : > { %829 = vst [vmem:[%s1726_s27 + $0x28] sm:$0xff] %v813_v11  ;;  %v815_v18 = vadd.f32 %v799_v54, %v783_v36  ;;  %v785_v20 = vmul.f32 %v769_v55, %v753_v16  ;;  %v770_v22 = vld [vmem:[#allocation2 + $0x10] sm:$0xff]  ;;  %v816_v2 = vadd.f32 %v800_v56, %v784_v6  ;;  %v755_v26 = vld [vmem:[%s1720_s14 + $0x58] sm:$0xff]  ;;  %v756_v32 = vld [vmem:[%s1720_s14 + $0x60] sm:$0xff] }
  0xfd   : > { %830 = vst [vmem:[%s1726_s27 + $0x30] sm:$0xff] %v814_v19  ;;  %v786_v23 = vmul.f32 %v770_v22, %v754_v21  ;;  %v771_v27 = vld [vmem:[#allocation2 + $0x38] sm:$0xff]  ;;  %v772_v24 = vld [vmem:[#allocation2 + $0x60] sm:$0xff]  ;;  %v757_v35 = vld [vmem:[%s1720_s14 + $0x68] sm:$0xff] }
  0xfe   : > { %v803_v28 = vld [vmem:[#allocation3 + $0x58] sm:$0xff]  ;;  %831 = vst [vmem:[%s1726_s27 + $0x38] sm:$0xff] %v815_v18  ;;  %v817_v30 = vadd.f32 %v801_v1, %v785_v20  ;;  %v787_v31 = vmul.f32 %v771_v27, %v755_v26  ;;  %v804_v39 = vld [vmem:[#allocation3] sm:$0xff]  ;;  %832 = vst [vmem:[%s1726_s27 + $0x40] sm:$0xff] %v816_v2  ;;  %v788_v33 = vmul.f32 %v772_v24, %v756_v32 }
  0xff   : > { %v818_v25 = vadd.f32 %v802_v17, %v786_v23  ;;  %v773_v4 = vld [vmem:[#allocation2 + $0x70] sm:$0xff]  ;;  %v805_v15 = vld [vmem:[#allocation3 + $0x8] sm:$0xff]  ;;  %v774_v41 = vld [vmem:[#allocation2 + $0x78] sm:$0xff] }
 0x100   : > { %833 = vst [vmem:[%s1726_s27 + $0x48] sm:$0xff] %v817_v30  ;;  %v819_v61 = vadd.f32 %v803_v28, %v787_v31  ;;  %v789_v38 = vmul.f32 %v773_v4, %v757_v35  ;;  %v758_v40 = vld [vmem:[%s1720_s14 + $0x70] sm:$0xff]  ;;  %v806_v42 = vld [vmem:[#allocation3 + $0x60] sm:$0xff]  ;;  %v820_v29 = vadd.f32 %v804_v39, %v788_v33  ;;  %v759_v45 = vld [vmem:[%s1720_s14 + $0x78] sm:$0xff]  ;;  %s1403_s14 = scalar_lea.vmem %s1402_s10, 4096 }
 0x101   : > { %834 = vst [vmem:[%s1726_s27 + $0x50] sm:$0xff] %v818_v25  ;;  %v790_v44 = vmul.f32 %v774_v41, %v758_v40  ;;  %v775_v46 = vld [vmem:[#allocation2 + $0x28] sm:$0xff]  ;;  %v807_v47 = vld [vmem:[#allocation3 + $0x50] sm:$0xff]  ;;  %p1405_p13 = scmp.lt.s32.totalorder %s1403_s14, %s1397_s6 }
 0x102   : > { %835 = vst [vmem:[%s1726_s27 + $0x58] sm:$0xff] %v819_v61  ;;  %v821_v48 = vadd.f32 %v805_v15, %v789_v38  ;;  %v791_v49 = vmul.f32 %v775_v46, %v759_v45  ;;  %836 = vst [vmem:[%s1726_s27 + $0x60] sm:$0xff] %v820_v29 }
 0x103   : > { %v822_v51 = vadd.f32 %v806_v42, %v790_v44  ;;  %p1406_p1 = por %p1405_p13, %p1404_p11 }
 0x104   : > { %837 = vst [vmem:[%s1726_s27 + $0x68] sm:$0xff] %v821_v48  ;;  %v823_v34 = vadd.f32 %v807_v47, %v791_v49 }
 0x105   : > { %838 = vst [vmem:[%s1726_s27 + $0x70] sm:$0xff] %v822_v51  ;;  %p1407_p2 = pnand %p1406_p1, %p1400_p9 }
 0x106   : > { %839 = vst [vmem:[%s1726_s27 + $0x78] sm:$0xff] %v823_v34 }
 0x107   : > { %1410 = shalt.err (!%p1407_p2)
}
 0x108   : > { %s1411_s27 = scalar_lea.hbm %s2005_s26, 2048  ;;  %s1415_s8 = scalar_lea.hbm %s2099_s1, 16384 }
 0x109   : > { %p1412_p4 = scmp.ne.s32.totalorder %s2005_s26, %s1411_s27  ;;  %p1416_p10 = scmp.lt.s32.totalorder %s2005_s26, %s2099_s1 }
 0x10a   : > { %p1417_p0 = scmp.lt.s32.totalorder %s1415_s8, %s1411_s27 }
 0x10b   : > { %p1413_p8 = pnand %p1412_p4, %p1671_p12 }
 0x10c   : > { %p1418_p3 = por %p1417_p0, %p1416_p10 }
 0x10d   : > { %p1414_p6 = pneg %p1413_p8 }
 0x10f   : > { %p1419_p5 = pnand %p1418_p3, %p1414_p6 }
 0x111   : > { %1422 = shalt.err (!%p1419_p5)
}
 0x112   : > { %s1515_s15 = smov 128   ;;  %s1516_s16 = smov 8  }
 0x113   : > { %1080 = dma.vmem_to_hbm [thread:$0]  (%p1671_p12), %s1999_s22, 2048, %s2005_s26, %s841_s3, %s1515_s15, %s1515_s15, %s1516_s16  }
 0x114 PF: > { %s2100_s29 = sld [smem:[#allocation20_spill]]  ;;  %p1112_p7 = scmp.ge.s32.totalorder %s1505_s25, 2 }
 0x115   : > { %s2101_s21 = sld [smem:[#allocation21_spill]] }
 0x11a   : > { %s874_s11 = sand.u32 1, %s2100_s29  }
 0x11b   : > { %p2102_p9 = scmp.ne.s32.totalorder %s2101_s21, 0  ;;  %s875_s12 = scalar_lea.sflag [#allocation6], %s874_s11 }
 0x11d   : > { %p1100_p11 = pnand %p1112_p7, %p2102_p9 }
 0x11f   : > { %p1101_p13 = pneg %p1100_p11 }
 0x121   : > { %1472 = dma.done.wait (%p1101_p13), %s875_s12, 2048  }
 0x122   : > { %1474 = vsyncadd (%p1101_p13), %s875_s12, 4294965248  ;;  %s24_s25 = sadd.s32 1, %s1505_s25   ;;  %s2103_s7 = sld [smem:[#allocation22_spill]] }
 0x123   : > { %p21_p1 = scmp.ge.s32.totalorder %s24_s25, 10   ;;  %s2104_s18 = smov %s1481_s19 }
 0x124   : > { %s2105_s19 = smov %s1485_s20  ;;  %s2106_s20 = smov %s1684_s2 }
 0x125   : > { %s2107_s21 = smov %s1497_s23  ;;  %s2108_s22 = smov %s1501_s24 }
 0x126   : > { %s2110_s24 = smov %s2116_s17  ;;  %23 = sbr.rel (!%p21_p1) target bundleno = 16 (0x10), region = 107 }
 0x128   : > { %s2109_s23 = smov %s2103_s7 }
 0x12b   :  { %880 = vsyncpa [#allocation5], 1 }
 0x12c   :  { %882 = vsyncpa [#allocation5 + $0x1], 1 }
 0x12d   :  { %883 = vsyncpa [#allocation6], 1 }
 0x12e   :  { %885 = vsyncpa [#allocation6 + $0x1], 1 }
 0x12f   :  { %886 = vsyncpa [#allocation7], 1 }
 0x130   :  { %888 = vsyncpa [#allocation7 + $0x1], 1 }
 0x131   :  { %889 = vsyncpa [#allocation8], 1 }
 0x132   :  { %891 = vsyncpa [#allocation8 + $0x1], 1 }
 0x133   :  { %892 = vsyncpa [#allocation11], 1 }

</bundles_post_ra>
